<compile_context>
chip_gen: v7x
topology: tpu7x:2x2x1
jax: 0.10.0
libtpu: 0.0.40
codegen_flags: <defaults>
</compile_context>

<pallas_src>
import functools

import jax
import jax.numpy as jnp
from jax.experimental import pallas as pl
from jax.experimental.pallas import tpu as pltpu

# ----------------------------- model config ---------------------------------
NUM_LAYERS = 3
HIDDEN_DIM = 64
GEO_FEAT_DIM = 15
NUM_LAYERS_COLOR = 4
HIDDEN_DIM_COLOR = 64
INPUT_CH = 3
INPUT_CH_VIEWS = 3

_LANE = 128


def _round_up(x, m):
    return ((x + m - 1) // m) * m


def _bf16_relu_ok():
    """bf16 elementwise max only pays off where the VPU has bf16 ALUs."""
    try:
        kind = jax.devices()[0].device_kind.lower()
    except Exception:
        return True
    return not any(t in kind for t in ("v2", "v3", "v4", "v5"))


def _act(x, bf16_relu):
    """ReLU + cast-to-bf16; relu(cast(x)) == cast(relu(x)) exactly."""
    if bf16_relu:
        return jnp.maximum(x.astype(jnp.bfloat16), 0)
    return jnp.maximum(x, 0).astype(jnp.bfloat16)


def nerf_small_kernel(x_ref,
                      s0_ref, s1_ref, s2_ref,
                      c0v_ref, c0g_ref, c1_ref, c2_ref, c3_ref,
                      out_ref, *, bf16_relu=True):
    """One tile of TN points through the full NeRFSmall MLP.

    x_ref:    (6, TN) bf16   rows 0-2 = pts, rows 3-5 = views
    s0_ref:   (64, 6) bf16   sigma layer 0, view columns zeroed
    s1_ref:   (64, 64) bf16  s2_ref: (16, 64) bf16
    c0v_ref:  (64, 6) bf16   color layer 0 view-dir columns (pts columns zeroed)
    c0g_ref:  (64, 16) bf16  color layer 0 geo-feat columns, zero col for sigma
    c1..c3:   (64,64), (64,64), (3,64) bf16
    out_ref:  (4, TN) f32    rows 0-2 = color, row 3 = sigma
    """
    f32 = jnp.float32
    x = x_ref[...]                                                      # (6, TN)

    # ---- sigma net: Linear -> ReLU -> Linear -> ReLU -> Linear ----
    h = jnp.dot(s0_ref[...], x, preferred_element_type=f32)            # (64, TN)
    h = _act(h, bf16_relu)
    h = jnp.dot(s1_ref[...], h, preferred_element_type=f32)
    h = _act(h, bf16_relu)
    h = jnp.dot(s2_ref[...], h, preferred_element_type=f32)            # (16, TN)

    out_ref[3:4, :] = h[0:1, :].astype(out_ref.dtype)                  # sigma

    # ---- color net: c0 @ concat(views, geo) == c0v_pad @ x + c0g_pad @ h ----
    h16 = h.astype(jnp.bfloat16)
    hc = (jnp.dot(c0v_ref[...], x, preferred_element_type=f32)
          + jnp.dot(c0g_ref[...], h16, preferred_element_type=f32))    # (64, TN)
    hc = _act(hc, bf16_relu)
    hc = jnp.dot(c1_ref[...], hc, preferred_element_type=f32)
    hc = _act(hc, bf16_relu)
    hc = jnp.dot(c2_ref[...], hc, preferred_element_type=f32)
    hc = _act(hc, bf16_relu)
    color = jnp.dot(c3_ref[...], hc, preferred_element_type=f32)       # (3, TN)

    out_ref[0:3, :] = color.astype(out_ref.dtype)


def _prep_weights(params):
    """Cast to bf16, keep PyTorch (out,in) layout, and zero-pad the two
    narrow first-layer weights so the kernel never slices the input block."""
    s0, s1, s2, c0, c1, c2, c3 = params
    # sigma layer 0 consumes rows 0-2 of x -> zero the view columns (3-5).
    s0p = jnp.concatenate(
        [s0, jnp.zeros((s0.shape[0], INPUT_CH_VIEWS), s0.dtype)], axis=1)   # (64, 6)
    # color layer 0 view part consumes rows 3-5 of x -> zero the pts columns.
    c0v = jnp.concatenate(
        [jnp.zeros((c0.shape[0], INPUT_CH), c0.dtype),
         c0[:, :INPUT_CH_VIEWS]], axis=1)                                   # (64, 6)
    # geo part: prepend an exactly-zero column so c0g @ h ignores the sigma
    # pre-activation carried in h row 0.
    c0g = jnp.pad(c0[:, INPUT_CH_VIEWS:], ((0, 0), (1, 0)))                 # (64, 16)
    ws = (s0p, s1, s2, c0v, c0g, c1, c2, c3)
    return tuple(w.astype(jnp.bfloat16) for w in ws)


def nerf_small_forward(x, params, *, tile_n=8192):
    """x: (..., 6) float32. Returns (..., 4) = [rgb(3), sigma(1)]."""
    orig_shape = x.shape
    feat = orig_shape[-1]
    assert feat == INPUT_CH + INPUT_CH_VIEWS
    x2 = x.reshape(-1, feat)
    n = x2.shape[0]

    # Points sit on the lane axis: tiles are multiples of 128 lanes.
    n_lanes = _round_up(n, _LANE)
    tile = max(_LANE, min(_round_up(tile_n, _LANE), n_lanes))
    # Keep >= 2 grid steps whenever possible so v7x's two TensorCores both
    # get work on the "parallel" axis.
    if tile >= n_lanes and n_lanes >= 2 * _LANE:
        tile = _round_up((n_lanes + 1) // 2, _LANE)
    n_pad = _round_up(n_lanes, tile)

    # Single channel-major bf16 input slab (one DMA stream per grid step).
    xt = x2.T.astype(jnp.bfloat16)                        # (6, n)
    if n_pad != n:
        xt = jnp.pad(xt, ((0, 0), (0, n_pad - n)))

    weights = _prep_weights(params)
    use_bf16_relu = _bf16_relu_ok()

    # Advisory cost hint for XLA's scheduler around the custom call.
    flops_per_pt = 2 * (6 * 64 + 64 * 64 + 64 * 16        # sigma net
                        + 6 * 64 + 16 * 64                 # split first color layer
                        + 64 * 64 + 64 * 64 + 64 * 3)      # rest of color net
    w_bytes = sum(int(w.size) * 2 for w in weights)
    cost = pl.CostEstimate(flops=flops_per_pt * n_pad,
                           transcendentals=0,
                           bytes_accessed=n_pad * (6 * 2 + 4 * 4) + w_bytes)

    kernel = functools.partial(nerf_small_kernel, bf16_relu=use_bf16_relu)

    out_t = pl.pallas_call(
        kernel,
        out_shape=jax.ShapeDtypeStruct((4, n_pad), jnp.float32),
        grid_spec=pltpu.PrefetchScalarGridSpec(
            num_scalar_prefetch=0,
            grid=(n_pad // tile,),
            in_specs=[pl.BlockSpec((feat, tile), lambda i: (0, i))]     # x
                     + [pl.BlockSpec(w.shape, lambda i: (0, 0))         # weights
                        for w in weights],
            out_specs=pl.BlockSpec((4, tile), lambda i: (0, i)),        # [rgb|sigma]
        ),
        compiler_params=pltpu.CompilerParams(
            dimension_semantics=("parallel",),
            # ~10 MiB live at tile=8192; 32 MiB gives headroom and covers
            # v5e's 16 MiB scoped default without crowding v7x's 64 MiB VMEM.
            vmem_limit_bytes=32 * 1024 * 1024),
        cost_estimate=cost,
    )(xt, *weights)

    # Single relayout back to the module's (..., 4) point-major layout.
    out = out_t[:, :n].T                                  # (n, 4)
    return out.reshape(orig_shape[:-1] + (4,))


def init_params(key):
    """Weights in PyTorch nn.Linear (out, in) layout, bias=False, with the
    torch-default init U(-1/sqrt(in_dim), 1/sqrt(in_dim))."""
    dims_sigma = []
    for l in range(NUM_LAYERS):
        in_dim = INPUT_CH if l == 0 else HIDDEN_DIM
        out_dim = (1 + GEO_FEAT_DIM) if l == NUM_LAYERS - 1 else HIDDEN_DIM
        dims_sigma.append((out_dim, in_dim))
    dims_color = []
    for l in range(NUM_LAYERS_COLOR):
        in_dim = (INPUT_CH_VIEWS + GEO_FEAT_DIM) if l == 0 else HIDDEN_DIM
        out_dim = 3 if l == NUM_LAYERS_COLOR - 1 else HIDDEN_DIM_COLOR
        dims_color.append((out_dim, in_dim))

    keys = jax.random.split(key, len(dims_sigma) + len(dims_color))
    params = []
    for k, (o, i) in zip(keys, dims_sigma + dims_color):
        bound = 1.0 / float(i) ** 0.5
        params.append(jax.random.uniform(k, (o, i), jnp.float32, -bound, bound))
    return tuple(params)


def reference_forward(x, params):
    """Pure-JAX f32 reference identical to the PyTorch forward."""
    s0, s1, s2, c0, c1, c2, c3 = params
    pts, views = x[..., :INPUT_CH], x[..., INPUT_CH:]
    h = pts
    for i, w in enumerate((s0, s1, s2)):
        h = h @ w.T
        if i != NUM_LAYERS - 1:
            h = jnp.maximum(h, 0.0)
    sigma, geo = h[..., 0], h[..., 1:]
    h = jnp.concatenate([views, geo], axis=-1)
    for i, w in enumerate((c0, c1, c2, c3)):
        h = h @ w.T
        if i != NUM_LAYERS_COLOR - 1:
            h = jnp.maximum(h, 0.0)
    return jnp.concatenate([h, sigma[..., None]], axis=-1)


if __name__ == "__main__":
    key = jax.random.PRNGKey(0)
    kp, kx = jax.random.split(key)
    params = init_params(kp)

    # small example: a batch of rays with samples along each ray (512 points);
    # the tile cap gives a 2-step grid even at this small size.
    n_rays, n_samples = 8, 64
    x = jax.random.normal(kx, (n_rays, n_samples, INPUT_CH + INPUT_CH_VIEWS),
                          jnp.float32)

    out = nerf_small_forward(x, params)
    out = jax.block_until_ready(out)

    ref = reference_forward(x, params)
    assert out.shape == (n_rays, n_samples, 4)
    # bf16 inputs + bf16 matmuls with f32 accumulation -> loose tolerance.
    assert jnp.allclose(out, ref, atol=3e-2, rtol=3e-2), \
        float(jnp.max(jnp.abs(out - ref)))

    print("KERNEL_OK")
</pallas_src>

<mosaic_0001>
module attributes {stable_mosaic.version = 11 : i64} {
  func.func @nerf_small_kernel(%arg0: i32, %arg1: memref<6x256xbf16, #tpu.memory_space<vmem>>, %arg2: memref<64x6xbf16, #tpu.memory_space<vmem>>, %arg3: memref<64x64xbf16, #tpu.memory_space<vmem>>, %arg4: memref<16x64xbf16, #tpu.memory_space<vmem>>, %arg5: memref<64x6xbf16, #tpu.memory_space<vmem>>, %arg6: memref<64x16xbf16, #tpu.memory_space<vmem>>, %arg7: memref<64x64xbf16, #tpu.memory_space<vmem>>, %arg8: memref<64x64xbf16, #tpu.memory_space<vmem>>, %arg9: memref<3x64xbf16, #tpu.memory_space<vmem>>, %arg10: memref<4x256xf32, #tpu.memory_space<vmem>>) attributes {dimension_semantics = [#tpu.dimension_semantics<parallel>], iteration_bounds = array<i64: 2>, scalar_prefetch = 0 : i64, scratch_operands = 0 : i64, tpu.core_type = #tpu.core_type<tc>, window_params = [{transform_indices = @transform_0, window_bounds = array<i64: 6, 256>}, {pipeline_mode = #tpu.pipeline_mode<synchronous>, transform_indices = @transform_1, window_bounds = array<i64: 64, 6>}, {pipeline_mode = #tpu.pipeline_mode<synchronous>, transform_indices = @transform_2, window_bounds = array<i64: 64, 64>}, {pipeline_mode = #tpu.pipeline_mode<synchronous>, transform_indices = @transform_3, window_bounds = array<i64: 16, 64>}, {pipeline_mode = #tpu.pipeline_mode<synchronous>, transform_indices = @transform_4, window_bounds = array<i64: 64, 6>}, {pipeline_mode = #tpu.pipeline_mode<synchronous>, transform_indices = @transform_5, window_bounds = array<i64: 64, 16>}, {pipeline_mode = #tpu.pipeline_mode<synchronous>, transform_indices = @transform_6, window_bounds = array<i64: 64, 64>}, {pipeline_mode = #tpu.pipeline_mode<synchronous>, transform_indices = @transform_7, window_bounds = array<i64: 64, 64>}, {pipeline_mode = #tpu.pipeline_mode<synchronous>, transform_indices = @transform_8, window_bounds = array<i64: 3, 64>}, {transform_indices = @transform_9, window_bounds = array<i64: 4, 256>}]} {
    %c0 = arith.constant 0 : index
    %c0_0 = arith.constant 0 : index
    %0 = vector.load %arg1[%c0, %c0_0] : memref<6x256xbf16, #tpu.memory_space<vmem>>, vector<6x256xbf16>
    %c0_1 = arith.constant 0 : index
    %c0_2 = arith.constant 0 : index
    %1 = vector.load %arg2[%c0_1, %c0_2] : memref<64x6xbf16, #tpu.memory_space<vmem>>, vector<64x6xbf16>
    %cst = arith.constant dense<0.000000e+00> : vector<64x256xf32>
    %2 = tpu.matmul %1, %0, %cst {dimension_numbers = #tpu.dot_dimension_numbers<[1], [0], [0], [1], [0, 0, 1, 1], [], []>} : vector<64x6xbf16>, vector<6x256xbf16>, vector<64x256xf32> -> vector<64x256xf32>
    %3 = arith.truncf %2 : vector<64x256xf32> to vector<64x256xbf16>
    %cst_3 = arith.constant 0.000000e+00 : bf16
    %4 = vector.broadcast %cst_3 : bf16 to vector<64x256xbf16>
    %5 = arith.maximumf %3, %4 : vector<64x256xbf16>
    %c0_4 = arith.constant 0 : index
    %c0_5 = arith.constant 0 : index
    %6 = vector.load %arg3[%c0_4, %c0_5] : memref<64x64xbf16, #tpu.memory_space<vmem>>, vector<64x64xbf16>
    %cst_6 = arith.constant dense<0.000000e+00> : vector<64x256xf32>
    %7 = tpu.matmul %6, %5, %cst_6 {dimension_numbers = #tpu.dot_dimension_numbers<[1], [0], [0], [1], [0, 0, 1, 1], [], []>} : vector<64x64xbf16>, vector<64x256xbf16>, vector<64x256xf32> -> vector<64x256xf32>
    %8 = arith.truncf %7 : vector<64x256xf32> to vector<64x256xbf16>
    %cst_7 = arith.constant 0.000000e+00 : bf16
    %9 = vector.broadcast %cst_7 : bf16 to vector<64x256xbf16>
    %10 = arith.maximumf %8, %9 : vector<64x256xbf16>
    %c0_8 = arith.constant 0 : index
    %c0_9 = arith.constant 0 : index
    %11 = vector.load %arg4[%c0_8, %c0_9] : memref<16x64xbf16, #tpu.memory_space<vmem>>, vector<16x64xbf16>
    %cst_10 = arith.constant dense<0.000000e+00> : vector<16x256xf32>
    %12 = tpu.matmul %11, %10, %cst_10 {dimension_numbers = #tpu.dot_dimension_numbers<[1], [0], [0], [1], [0, 0, 1, 1], [], []>} : vector<16x64xbf16>, vector<64x256xbf16>, vector<16x256xf32> -> vector<16x256xf32>
    %13 = vector.extract_strided_slice %12 {offsets = [0, 0], sizes = [1, 256], strides = [1, 1]} : vector<16x256xf32> to vector<1x256xf32>
    %c3 = arith.constant 3 : index
    %c0_11 = arith.constant 0 : index
    %14 = vector.load %arg10[%c3, %c0_11] : memref<4x256xf32, #tpu.memory_space<vmem>>, vector<1x256xf32>
    tpu.vector_store %arg10[%c3, %c0_11], %13 {strides = array<i32>} : memref<4x256xf32, #tpu.memory_space<vmem>>, vector<1x256xf32>,
    %15 = arith.truncf %12 : vector<16x256xf32> to vector<16x256xbf16>
    %c0_12 = arith.constant 0 : index
    %c0_13 = arith.constant 0 : index
    %16 = vector.load %arg5[%c0_12, %c0_13] : memref<64x6xbf16, #tpu.memory_space<vmem>>, vector<64x6xbf16>
    %cst_14 = arith.constant dense<0.000000e+00> : vector<64x256xf32>
    %17 = tpu.matmul %16, %0, %cst_14 {dimension_numbers = #tpu.dot_dimension_numbers<[1], [0], [0], [1], [0, 0, 1, 1], [], []>} : vector<64x6xbf16>, vector<6x256xbf16>, vector<64x256xf32> -> vector<64x256xf32>
    %c0_15 = arith.constant 0 : index
    %c0_16 = arith.constant 0 : index
    %18 = vector.load %arg6[%c0_15, %c0_16] : memref<64x16xbf16, #tpu.memory_space<vmem>>, vector<64x16xbf16>
    %cst_17 = arith.constant dense<0.000000e+00> : vector<64x256xf32>
    %19 = tpu.matmul %18, %15, %cst_17 {dimension_numbers = #tpu.dot_dimension_numbers<[1], [0], [0], [1], [0, 0, 1, 1], [], []>} : vector<64x16xbf16>, vector<16x256xbf16>, vector<64x256xf32> -> vector<64x256xf32>
    %20 = arith.addf %17, %19 : vector<64x256xf32>
    %21 = arith.truncf %20 : vector<64x256xf32> to vector<64x256xbf16>
    %cst_18 = arith.constant 0.000000e+00 : bf16
    %22 = vector.broadcast %cst_18 : bf16 to vector<64x256xbf16>
    %23 = arith.maximumf %21, %22 : vector<64x256xbf16>
    %c0_19 = arith.constant 0 : index
    %c0_20 = arith.constant 0 : index
    %24 = vector.load %arg7[%c0_19, %c0_20] : memref<64x64xbf16, #tpu.memory_space<vmem>>, vector<64x64xbf16>
    %cst_21 = arith.constant dense<0.000000e+00> : vector<64x256xf32>
    %25 = tpu.matmul %24, %23, %cst_21 {dimension_numbers = #tpu.dot_dimension_numbers<[1], [0], [0], [1], [0, 0, 1, 1], [], []>} : vector<64x64xbf16>, vector<64x256xbf16>, vector<64x256xf32> -> vector<64x256xf32>
    %26 = arith.truncf %25 : vector<64x256xf32> to vector<64x256xbf16>
    %cst_22 = arith.constant 0.000000e+00 : bf16
    %27 = vector.broadcast %cst_22 : bf16 to vector<64x256xbf16>
    %28 = arith.maximumf %26, %27 : vector<64x256xbf16>
    %c0_23 = arith.constant 0 : index
    %c0_24 = arith.constant 0 : index
    %29 = vector.load %arg8[%c0_23, %c0_24] : memref<64x64xbf16, #tpu.memory_space<vmem>>, vector<64x64xbf16>
    %cst_25 = arith.constant dense<0.000000e+00> : vector<64x256xf32>
    %30 = tpu.matmul %29, %28, %cst_25 {dimension_numbers = #tpu.dot_dimension_numbers<[1], [0], [0], [1], [0, 0, 1, 1], [], []>} : vector<64x64xbf16>, vector<64x256xbf16>, vector<64x256xf32> -> vector<64x256xf32>
    %31 = arith.truncf %30 : vector<64x256xf32> to vector<64x256xbf16>
    %cst_26 = arith.constant 0.000000e+00 : bf16
    %32 = vector.broadcast %cst_26 : bf16 to vector<64x256xbf16>
    %33 = arith.maximumf %31, %32 : vector<64x256xbf16>
    %c0_27 = arith.constant 0 : index
    %c0_28 = arith.constant 0 : index
    %34 = vector.load %arg9[%c0_27, %c0_28] : memref<3x64xbf16, #tpu.memory_space<vmem>>, vector<3x64xbf16>
    %cst_29 = arith.constant dense<0.000000e+00> : vector<3x256xf32>
    %35 = tpu.matmul %34, %33, %cst_29 {dimension_numbers = #tpu.dot_dimension_numbers<[1], [0], [0], [1], [0, 0, 1, 1], [], []>} : vector<3x64xbf16>, vector<64x256xbf16>, vector<3x256xf32> -> vector<3x256xf32>
    %c0_30 = arith.constant 0 : index
    %c0_31 = arith.constant 0 : index
    %36 = vector.load %arg10[%c0_30, %c0_31] : memref<4x256xf32, #tpu.memory_space<vmem>>, vector<3x256xf32>
    tpu.vector_store %arg10[%c0_30, %c0_31], %35 {strides = array<i32>} : memref<4x256xf32, #tpu.memory_space<vmem>>, vector<3x256xf32>,
    return
  }
  func.func @transform_0(%arg0: i32) -> (i32, i32) {
    %c0_i32 = arith.constant 0 : i32
    %c0_i32_0 = arith.constant 0 : i32
    return %c0_i32, %arg0 : i32, i32
  }
  func.func @transform_1(%arg0: i32) -> (i32, i32) {
    %c0_i32 = arith.constant 0 : i32
    %c0_i32_0 = arith.constant 0 : i32
    %c0_i32_1 = arith.constant 0 : i32
    return %c0_i32, %c0_i32_0 : i32, i32
  }
  func.func @transform_2(%arg0: i32) -> (i32, i32) {
    %c0_i32 = arith.constant 0 : i32
    %c0_i32_0 = arith.constant 0 : i32
    %c0_i32_1 = arith.constant 0 : i32
    return %c0_i32, %c0_i32_0 : i32, i32
  }
  func.func @transform_3(%arg0: i32) -> (i32, i32) {
    %c0_i32 = arith.constant 0 : i32
    %c0_i32_0 = arith.constant 0 : i32
    %c0_i32_1 = arith.constant 0 : i32
    return %c0_i32, %c0_i32_0 : i32, i32
  }
  func.func @transform_4(%arg0: i32) -> (i32, i32) {
    %c0_i32 = arith.constant 0 : i32
    %c0_i32_0 = arith.constant 0 : i32
    %c0_i32_1 = arith.constant 0 : i32
    return %c0_i32, %c0_i32_0 : i32, i32
  }
  func.func @transform_5(%arg0: i32) -> (i32, i32) {
    %c0_i32 = arith.constant 0 : i32
    %c0_i32_0 = arith.constant 0 : i32
    %c0_i32_1 = arith.constant 0 : i32
    return %c0_i32, %c0_i32_0 : i32, i32
  }
  func.func @transform_6(%arg0: i32) -> (i32, i32) {
    %c0_i32 = arith.constant 0 : i32
    %c0_i32_0 = arith.constant 0 : i32
    %c0_i32_1 = arith.constant 0 : i32
    return %c0_i32, %c0_i32_0 : i32, i32
  }
  func.func @transform_7(%arg0: i32) -> (i32, i32) {
    %c0_i32 = arith.constant 0 : i32
    %c0_i32_0 = arith.constant 0 : i32
    %c0_i32_1 = arith.constant 0 : i32
    return %c0_i32, %c0_i32_0 : i32, i32
  }
  func.func @transform_8(%arg0: i32) -> (i32, i32) {
    %c0_i32 = arith.constant 0 : i32
    %c0_i32_0 = arith.constant 0 : i32
    %c0_i32_1 = arith.constant 0 : i32
    return %c0_i32, %c0_i32_0 : i32, i32
  }
  func.func @transform_9(%arg0: i32) -> (i32, i32) {
    %c0_i32 = arith.constant 0 : i32
    %c0_i32_0 = arith.constant 0 : i32
    return %c0_i32, %arg0 : i32, i32
  }
}

</mosaic_0001>

<bundles_post_ra>
// kernel: tpu_custom_call.1
= control target key start
LH: loop header
LB: loop body
LE: loop exit
PB: predicated region body
PF: predicated region fallthrough
CT: control target
= control target key end

     0   :  { %14 = vsyncpa [#allocation3], 0  ;;  %s1976_s0 = inlined_call_operand.vmem [shape: bf16[6,512], index: 0, kind: input, shape index: {}]   ;;  %s1977_s1 = inlined_call_operand.vmem [shape: bf16[64,6], index: 1, kind: input, shape index: {}]   ;;  %s1978_s2 = inlined_call_operand.vmem [shape: bf16[64,64], index: 2, kind: input, shape index: {}]   ;;  %s1979_s3 = inlined_call_operand.hbm [shape: bf16[16,64], index: 3, kind: input, shape index: {}]   ;;  %s1980_s4 = inlined_call_operand.vmem [shape: bf16[64,6], index: 4, kind: input, shape index: {}]   ;;  %s1981_s5 = inlined_call_operand.vmem [shape: bf16[64,16], index: 5, kind: input, shape index: {}]   ;;  %s1982_s6 = inlined_call_operand.vmem [shape: bf16[64,64], index: 6, kind: input, shape index: {}]   ;;  %s1983_s7 = inlined_call_operand.vmem [shape: bf16[64,64], index: 7, kind: input, shape index: {}]   ;;  %s1984_s8 = inlined_call_operand.vmem [shape: bf16[3,64], index: 8, kind: input, shape index: {}]   ;;  %s1985_s9 = inlined_call_operand.hbm [shape: f32[4,512], index: 9, kind: output, shape index: {}]  }
   0x1   :  { %15 = vsyncpa [#allocation4], 0 }
   0x2   :  { %17 = vsyncpa [#allocation4 + $0x1], 0  ;;  %s1659_s30 = smov 0   ;;  %s1661_s10 = smov 0  }
   0x3   :  { %s1663_s11 = smov 0   ;;  %s1665_s12 = smov 0  }
   0x4 LB: > { %s1680_s13 = sadd.s32 4294967295, %s1601_s12   ;;  %s1339_s14 = sadd.s32 4294967294, %s1601_s12   ;;  %s1601_s12 = sphi %s1665_s12, %s2001_s12   ;;  %s1597_s11 = sphi %s1663_s11, %s2000_s11   ;;  %s1593_s10 = sphi %s1661_s10, %s1999_s10   ;;  %s1589_s30 = sphi %s1659_s30, %s1998_s30  }
   0x5   : > { %s1684_s15 = sadd.s32 1, %s1601_s12   ;;  %s224_s16 = sadd.s32 1, %s1597_s11 }
   0x6   : > { %s221_s17 = ssub.s32 %s1601_s12, %s1684_s15  ;;  %p234_p0 = scmp.ne.s32.totalorder %s1597_s11, %s1593_s10 }
   0x7   : > { %p222_p1 = scmp.eq.s32.totalorder %s221_s17, 0  ;;  %p235_p2 = scmp.eq.s32.totalorder %s1680_s13, 1 }
   0x8   : > { %p240_p3 = scmp.ne.s32.totalorder %s1593_s10, %s1589_s30  ;;  %p241_p4 = scmp.eq.s32.totalorder %s1339_s14, 1 }
   0x9   : > { %s1695_s18 = scalar_select %p222_p1, %s1597_s11, %s224_s16  }
   0xa   : > { %p1697_p5 = por %p235_p2, %p234_p0  ;;  %p1701_p6 = por %p241_p4, %p240_p3 }
   0xb   : > { %p1340_p7 = scmp.ge.s32.totalorder %s1601_s12, 1  ;;  %p248_p8 = scmp.lt.s32.totalorder %s1601_s12, 3 }
   0xc   : > { %s1989_s19 = scalar_select %p1697_p5, 1, 0 }
   0xd   : > { %s1990_s20 = scalar_select %p1701_p6, 1, 0 }
   0xe   : > { %p1986_p9 = scmp.eq.s32.totalorder %s1680_s13, 0  ;;  %p1708_p10 = pnand %p1340_p7, %p248_p8 }
   0xf   : > { %s1603_s22 = smov [#allocation2]   ;;  %s1507_s27 = scalar_lea.hbm %s1979_s3, 128 }
  0x10   : > { %s1991_s21 = scalar_select %p1708_p10, 1, 0 }
  0x11   : > { %s266_s23 = sshll.u32 %s1603_s22, 4  ;;  %p1432_p11 = pneg %p1708_p10  ;;  %s267_s23 = int_to_ptr.vmem [resolvable:$true] %s266_s23 }
  0x12   : > { %p1508_p13 = scmp.ne.s32.totalorder %s1979_s3, %s1507_s27  ;;  %p1514_p3 = scmp.lt.u32.totalorder %s1507_s27, %s1979_s3 }
  0x13   : > { %p1716_p12 = pnand %p1986_p9, %p1432_p11 }
  0x15   : > { %p1509_p0 = pneg %p1716_p12 }
  0x17   : > { %p1510_p1 = pnand %p1509_p0, %p1508_p13 }
  0x19   : > { %p1511_p2 = pneg %p1510_p1 }
  0x1b   : > { %p1516_p4 = pnand %p1514_p3, %p1511_p2 }
  0x1d   : > { %1519 = shalt.err (!%p1516_p4)
}
  0x1e   : > { %s1520_s17 = scalar_lea.vmem %s267_s23, 128  ;;  %p1528_p9 = scmp.lt.s32.totalorder %s267_s23, %s267_s23 }
  0x1f   : > { %p1521_p7 = scmp.ne.s32.totalorder %s267_s23, %s1520_s17  ;;  %p1529_p6 = scmp.lt.s32.totalorder %s1520_s17, %s1520_s17 }
  0x21   : > { %p1523_p8 = pnand %p1521_p7, %p1509_p0  ;;  %p1530_p5 = por %p1529_p6, %p1528_p9 }
  0x23   : > { %p1524_p11 = pneg %p1523_p8 }
  0x25   : > { %p1531_p10 = pnand %p1530_p5, %p1524_p11 }
  0x27   : > { %1534 = shalt.err (!%p1531_p10)
}
  0x28   : > { %s1604_s22 = smov 64   ;;  %s1605_s25 = smov 4  }
  0x29   : > { %1435 = dma.hbm_to_vmem [thread:$0]  (!%p1716_p12), %s1979_s3, 128, %s267_s23, [#allocation3], %s1604_s22, %s1604_s22, %s1605_s25  }
  0x2a   : > { %p1993_p13 = scmp.ne.s32.totalorder %s1991_s21, 0 }
  0x2b   : > { %p1994_p1 = scmp.eq.s32.totalorder (!%p1993_p13), %s1680_s13, 0 }
  0x2c   : > { %306 = sbr.rel (%p1993_p13) target bundleno = 1782 (0x6f6), region = 56 }
  0x33   : > { %1580 = dma.done.wait (%p1994_p1), [#allocation3], 128   ;;  %p1995_p0 = pmov %p1994_p1 }
  0x34   : > { %s1346_s27 = sshll.u32 %s1680_s13, 1  ;;  %v1606_v0 = vmov 0   ;;  %vm397_vm0 = vcmask 1042432   ;;  %v1482_v5 = vld [vmem:[%s1977_s1] sm:$0xff]   ;;  %vm384_vm1 = vcmask 48128   ;;  %v1483_v6 = vld [vmem:[%s1977_s1 + $0x8] sm:$0xff]  }
  0x35   : > { %1582 = vsyncadd (%p1995_p0), [#allocation3], 4294967168  ;;  %p343_p5 = scmp.lt.s32.totalorder %s1346_s27, 3  ;;  %436 = vmatprep.mubr.bf16.mxu0 %v1606_v0  ;;  %566 = vmatprep.mubr.bf16.mxu1 %v1606_v0  ;;  %v1484_v7 = vld [vmem:[%s1977_s1 + $0x10] sm:$0xff]   ;;  %v1485_v8 = vld [vmem:[%s1977_s1 + $0x18] sm:$0xff]   ;;  %vm521_vm2 = vcmask 523264  }
  0x36   : > { %v1486_v41 = vld [vmem:[%s1978_s2] sm:$0xff]   ;;  %v1487_v42 = vld [vmem:[%s1978_s2 + $0x8] sm:$0xff]   ;;  %v1488_v43 = vld [vmem:[%s1978_s2 + $0x10] sm:$0xff]   ;;  %s339_s25 = sand.u32 1, %s1593_s10   ;;  %vm738_vm4 = vcmask 130048   ;;  %p1996_p9 = scmp.ne.s32.totalorder %s1989_s19, 0 }
  0x37   : > { %s2003_s27 = smov (!%p343_p5, %s1346_s27), 3  ;;  %v1489_v44 = vld [vmem:[%s1978_s2 + $0x18] sm:$0xff]   ;;  %s1345_s26 = sshll.u32 %s339_s25, 3 }
  0x38   : > { %s1347_s24 = sshll.u32 %s2003_s27, 2  ;;  %s1608_s28 = smov [#allocation5]  }
  0x39   : > { %s346_s21 = scalar_lea.vmem %s1976_s0, %s1347_s24  ;;  %s1822_s24 = scalar_lea.vmem [#allocation5], %s1345_s26 }
  0x3a   : > { %v350_v1 = vld [vmem:[%s346_s21] sm:$0x77]  ;;  %s1409_s21 = sshll.u32 %s1680_s13, 7  ;;  %s1268_s14 = sshll.u32 %s1822_s24, 4  ;;  %s1933_s14 = int_to_ptr.vmem [resolvable:$true] %s1268_s14 }
  0x3b   : > { %v1748_v2 = vcombine.high %v350_v1, %v350_v1  ;;  %v1352_v3 = vcombine.low %v350_v1, %v350_v1  ;;  %s1931_s22 = scalar_lea.hbm %s1985_s9, %s1409_s21  ;;  %s1254_s26 = scalar_lea.sflag [#allocation4], %s339_s25 }
  0x3c   : > { %s1535_s13 = scalar_lea.vmem %s1933_s14, 128  ;;  %s1539_s27 = sshll.u32 %s1608_s28, 4  ;;  %s1540_s27 = int_to_ptr.vmem [resolvable:$false] %s1539_s27 }
  0x3d   : > { %1354 = vmatprep.subr.msk.bf16.mxu0 %vm397_vm0, %v1748_v2  ;;  %v1753_v4 = vsel %vm397_vm0, %v1352_v3, 0  ;;  %p1536_p6 = scmp.ne.s32.totalorder %s1933_s14, %s1535_s13  ;;  %s1541_s23 = scalar_lea.vmem %s1540_s27, 256 }
  0x3e   : > { %405 = vmatpush1.bf16.msra.mxu0 %v1753_v4  ;;  %p1542_p2 = scmp.lt.s32.totalorder %s1933_s14, %s1540_s27  ;;  %p1543_p3 = scmp.lt.s32.totalorder %s1541_s23, %s1535_s13 }
  0x3f   : > { %p1537_p10 = pnand %p1536_p6, %p1996_p9 }
  0x40   : > { %p1544_p4 = por %p1543_p3, %p1542_p2 }
  0x41   : > { %1355 = vmatmul.mubr.msk.bf16.vlgmr.msra.gmra.mrb[0].mxu0 %vm384_vm1, %v1482_v5  ;;  %p1538_p12 = pneg %p1537_p10 }
  0x42   : > { %446 = vmatprep.mubr.bf16.mxu0 %v1606_v0 }
  0x43   : > { %p1545_p7 = pnand %p1544_p4, %p1538_p12 }
  0x49   : > { %1356 = vmatmul.mubr.msk.bf16.gmra.mrb[4].mxu0 %vm384_vm1, %v1483_v6 }
  0x4a   : > { %456 = vmatprep.mubr.bf16.mxu0 %v1606_v0 }
  0x51   : > { %1357 = vmatmul.mubr.msk.bf16.gmra.mrb[8].mxu0 %vm384_vm1, %v1484_v7 }
  0x52   : > { %466 = vmatprep.mubr.bf16.mxu0 %v1606_v0 }
  0x59   : > { %1358 = vmatmul.mubr.msk.bf16.gmra.mrb[12].mxu0 %vm384_vm1, %v1485_v8 }
  0x5a   : > { %665 = vmatprep.mubr.bf16.mxu0 %v1606_v0 }
 0x114   : > { %v438_v9 = vpop.f32.mrb[0].mxu0 }
 0x115   : > { %v440_v10 = vpop.f32.mrb[1].mxu0 }
 0x116   : > { %v442_v11 = vpop.f32.mrb[2].mxu0 }
 0x117   : > { %v477_v12 = vpack.c.bf16 %v442_v11, %v438_v9  ;;  %v444_v13 = vpop.f32.mrb[3].mxu0 }
 0x118   : > { %v478_v14 = vpack.c.bf16 %v444_v13, %v440_v10 }
 0x119   : > { %v485_v16 = vmax.bf16 %v1606_v0, %v477_v12 }
 0x11a   : > { %v486_v15 = vmax.bf16 %v1606_v0, %v478_v14 }
 0x11c   : > { %v448_v17 = vpop.f32.mrb[4].mxu0  ;;  %534 = vmatprep.subr.bf16.mxu1 %v486_v15 }
 0x11d   : > { %v450_v18 = vpop.f32.mrb[5].mxu0  ;;  %535 = vmatpush1.bf16.msra.mxu1 %v485_v16  ;;  %v1490_v16 = vld [vmem:[#allocation2] sm:$0xff]  }
 0x11e   : > { %v452_v19 = vpop.f32.mrb[6].mxu0 }
 0x11f   : > { %v479_v20 = vpack.c.bf16 %v452_v19, %v448_v17  ;;  %v454_v21 = vpop.f32.mrb[7].mxu0  ;;  %v1607_v17 = vmov 1966171168   ;;  %v682_v19 = vlaneseq }
 0x120   : > { %v480_v22 = vpack.c.bf16 %v454_v21, %v450_v18  ;;  %v680_v18 = vunpack.c.l.s4 %v1607_v17 }
 0x121   : > { %v487_v24 = vmax.bf16 %v1606_v0, %v479_v20  ;;  %v683_v21 = vshrl.u32 %v682_v19, 7  ;;  %vm696_vm3 = vcmp.lt.s32.totalorder %v682_v19, 256 }
 0x122   : > { %v488_v23 = vmax.bf16 %v1606_v0, %v480_v22  ;;  %v681_v20 = vunpack.c.0.s8 %v680_v18 }
 0x124   : > { %v458_v25 = vpop.f32.mrb[8].mxu0  ;;  %536 = vmatprep.subr.bf16.mxu1 %v488_v23  ;;  %v684_v23 = vsub.s32 %v681_v20, %v683_v21 }
 0x125   : > { %v460_v26 = vpop.f32.mrb[9].mxu0  ;;  %537 = vmatpush1.bf16.msra.mxu1 %v487_v24 }
 0x126   : > { %v462_v27 = vpop.f32.mrb[10].mxu0 }
 0x127   : > { %v481_v28 = vpack.c.bf16 %v462_v27, %v458_v25  ;;  %v464_v29 = vpop.f32.mrb[11].mxu0 }
 0x128   : > { %v482_v30 = vpack.c.bf16 %v464_v29, %v460_v26 }
 0x129   : > { %v489_v32 = vmax.bf16 %v1606_v0, %v481_v28 }
 0x12a   : > { %v490_v31 = vmax.bf16 %v1606_v0, %v482_v30 }
 0x12c   : > { %v468_v33 = vpop.f32.mrb[12].mxu0  ;;  %538 = vmatprep.subr.bf16.mxu1 %v490_v31 }
 0x12d   : > { %v470_v34 = vpop.f32.mrb[13].mxu0  ;;  %539 = vmatpush1.bf16.msra.mxu1 %v489_v32  ;;  %v1491_v32 = vld [vmem:[%s1981_s5] sm:$0xff]  }
 0x12e   : > { %v472_v35 = vpop.f32.mrb[14].mxu0 }
 0x12f   : > { %v483_v36 = vpack.c.bf16 %v472_v35, %v468_v33  ;;  %v474_v37 = vpop.f32.mrb[15].mxu0  ;;  %v1492_v33 = vld [vmem:[%s1981_s5 + $0x8] sm:$0xff]  }
 0x130   : > { %v484_v38 = vpack.c.bf16 %v474_v37, %v470_v34  ;;  %v1495_v34 = vld [vmem:[%s1980_s4] sm:$0xff]   ;;  %v1496_v35 = vld [vmem:[%s1980_s4 + $0x8] sm:$0xff]   ;;  %v1498_v37 = vld [vmem:[%s1980_s4 + $0x18] sm:$0xff]  }
 0x131   : > { %v491_v40 = vmax.bf16 %v1606_v0, %v483_v36  ;;  %v1497_v36 = vld [vmem:[%s1980_s4 + $0x10] sm:$0xff]  }
 0x132   : > { %v492_v39 = vmax.bf16 %v1606_v0, %v484_v38 }
 0x134   : > { %540 = vmatprep.subr.bf16.mxu1 %v492_v39 }
 0x135   : > { %541 = vmatpush1.bf16.msra.mxu1 %v491_v40 }
 0x138   : > { %1363 = vmatmul.mubr.msk.bf16.vlgmr.msra.gmra.mrb[0].mxu1 %vm521_vm2, %v1486_v41 }
 0x139   : > { %576 = vmatprep.mubr.bf16.mxu1 %v1606_v0 }
 0x140   : > { %1364 = vmatmul.mubr.msk.bf16.gmra.mrb[4].mxu1 %vm521_vm2, %v1487_v42 }
 0x141   : > { %586 = vmatprep.mubr.bf16.mxu1 %v1606_v0 }
 0x148   : > { %1365 = vmatmul.mubr.msk.bf16.gmra.mrb[8].mxu1 %vm521_vm2, %v1488_v43 }
 0x149   : > { %596 = vmatprep.mubr.bf16.mxu1 %v1606_v0 }
 0x150   : > { %1366 = vmatmul.mubr.msk.bf16.gmra.mrb[12].mxu1 %vm521_vm2, %v1489_v44 }
 0x151   : > { %1017 = vmatprep.mubr.bf16.mxu1 %v1606_v0 }
 0x20b   : > { %v568_v45 = vpop.f32.mrb[0].mxu1 }
 0x20c   : > { %v570_v46 = vpop.f32.mrb[1].mxu1 }
 0x20d   : > { %v572_v47 = vpop.f32.mrb[2].mxu1 }
 0x20e   : > { %v607_v48 = vpack.c.bf16 %v572_v47, %v568_v45  ;;  %v574_v49 = vpop.f32.mrb[3].mxu1 }
 0x20f   : > { %v608_v50 = vpack.c.bf16 %v574_v49, %v570_v46 }
 0x210   : > { %v615_v52 = vmax.bf16 %v1606_v0, %v607_v48 }
 0x211   : > { %v616_v51 = vmax.bf16 %v1606_v0, %v608_v50 }
 0x213   : > { %v578_v53 = vpop.f32.mrb[4].mxu1  ;;  %633 = vmatprep.subr.bf16.mxu0 %v616_v51 }
 0x214   : > { %v580_v54 = vpop.f32.mrb[5].mxu1  ;;  %634 = vmatpush1.bf16.msra.mxu0 %v615_v52 }
 0x215   : > { %v582_v55 = vpop.f32.mrb[6].mxu1 }
 0x216   : > { %v609_v56 = vpack.c.bf16 %v582_v55, %v578_v53  ;;  %v584_v57 = vpop.f32.mrb[7].mxu1 }
 0x217   : > { %v610_v58 = vpack.c.bf16 %v584_v57, %v580_v54 }
 0x218   : > { %v617_v60 = vmax.bf16 %v1606_v0, %v609_v56 }
 0x219   : > { %v618_v59 = vmax.bf16 %v1606_v0, %v610_v58 }
 0x21b   : > { %v588_v61 = vpop.f32.mrb[8].mxu1  ;;  %635 = vmatprep.subr.bf16.mxu0 %v618_v59 }
 0x21c   : > { %v590_v62 = vpop.f32.mrb[9].mxu1  ;;  %636 = vmatpush1.bf16.msra.mxu0 %v617_v60 }
 0x21d   : > { %v592_v63 = vpop.f32.mrb[10].mxu1 }
 0x21e   : > { %v611_v1 = vpack.c.bf16 %v592_v63, %v588_v61  ;;  %v594_v3 = vpop.f32.mrb[11].mxu1 }
 0x21f   : > { %v612_v5 = vpack.c.bf16 %v594_v3, %v590_v62 }
 0x220   : > { %v619_v7 = vmax.bf16 %v1606_v0, %v611_v1 }
 0x221   : > { %v620_v6 = vmax.bf16 %v1606_v0, %v612_v5 }
 0x223   : > { %v598_v8 = vpop.f32.mrb[12].mxu1  ;;  %637 = vmatprep.subr.bf16.mxu0 %v620_v6 }
 0x224   : > { %v600_v9 = vpop.f32.mrb[13].mxu1  ;;  %638 = vmatpush1.bf16.msra.mxu0 %v619_v7 }
 0x225   : > { %v602_v10 = vpop.f32.mrb[14].mxu1 }
 0x226   : > { %v613_v11 = vpack.c.bf16 %v602_v10, %v598_v8  ;;  %v604_v12 = vpop.f32.mrb[15].mxu1  ;;  %v1500_v10 = vld [vmem:[%s1982_s6 + $0x8] sm:$0xff]  }
 0x227   : > { %v614_v13 = vpack.c.bf16 %v604_v12, %v600_v9  ;;  %v1499_v9 = vld [vmem:[%s1982_s6] sm:$0xff]   ;;  %v1502_v12 = vld [vmem:[%s1982_s6 + $0x18] sm:$0xff]  }
 0x228   : > { %v621_v15 = vmax.bf16 %v1606_v0, %v613_v11  ;;  %v1501_v11 = vld [vmem:[%s1982_s6 + $0x10] sm:$0xff]  }
 0x229   : > { %v622_v14 = vmax.bf16 %v1606_v0, %v614_v13 }
 0x22b   : > { %639 = vmatprep.subr.bf16.mxu0 %v622_v14 }
 0x22c   : > { %640 = vmatpush1.bf16.msra.mxu0 %v621_v15 }
 0x22f   : > { %1368 = vmatmul.mubr.msk.bf16.vlgmr.msra.gmra.mrb[16].mxu0 %vm521_vm2, %v1490_v16 }
 0x230   : > { %783 = vmatprep.mubr.bf16.mxu0 %v1606_v0 }
 0x302   : > { %v667_v22 = vpop.f32.mrb[16].mxu0 }
 0x303   : > { %v669_v24 = vpop.f32.mrb[17].mxu0 }
 0x304   : > { %v678_v25 = vcombine.low %v667_v22, %v669_v24  ;;  %v671_v26 = vpop.f32.mrb[18].mxu0 }
 0x305   : > { %v700_v27 = vpack.c.bf16 %v671_v26, %v667_v22  ;;  %v673_v28 = vpop.f32.mrb[19].mxu0 }
 0x306   : > { %v685_v29 = vrot.slane %v678_v25, %v684_v23  ;;  %v701_v30 = vpack.c.bf16 %v673_v28, %v669_v24 }
 0x308   : > { %v692_v31 = vrot.slane %v685_v29, %v684_v23  ;;  %751 = vmatprep.subr.bf16.mxu0 %v701_v30 }
 0x309   : > { %752 = vmatpush1.bf16.msra.mxu0 %v700_v27 }
 0x30a   : > { %1382 = vmatprep.subr.msk.bf16.mxu0 %vm397_vm0, %v1748_v2  ;;  %1369 = vst.msk [vmem:[%s1822_s24 + $0x3] ss:$4 sm:$0x3] %vm696_vm3, %v692_v31  ;;  %v1493_v2 = vld [vmem:[%s1981_s5 + $0x10] sm:$0xff]  }
 0x30c   : > { %1374 = vmatmul.mubr.msk.bf16.vlgmr.msra.gmra.mrb[20].mxu0 %vm738_vm4, %v1491_v32 }
 0x30d   : > { %857 = vmatpush1.bf16.msra.mxu0 %v1753_v4  ;;  %793 = vmatprep.mubr.bf16.mxu0 %v1606_v0  ;;  %v1494_v4 = vld [vmem:[%s1981_s5 + $0x18] sm:$0xff]  }
 0x314   : > { %1375 = vmatmul.mubr.msk.bf16.gmra.mrb[24].mxu0 %vm738_vm4, %v1492_v33 }
 0x315   : > { %803 = vmatprep.mubr.bf16.mxu0 %v1606_v0 }
 0x31c   : > { %1376 = vmatmul.mubr.msk.bf16.gmra.mrb[28].mxu0 %vm738_vm4, %v1493_v2 }
 0x31d   : > { %813 = vmatprep.mubr.bf16.mxu0 %v1606_v0 }
 0x324   : > { %1377 = vmatmul.mubr.msk.bf16.gmra.mrb[32].mxu0 %vm738_vm4, %v1494_v4 }
 0x325   : > { %888 = vmatprep.mubr.bf16.mxu0 %v1606_v0 }
 0x32c   : > { %1383 = vmatmul.mubr.msk.bf16.vlgmr.msra.gmra.mrb[20].mxu0 %vm384_vm1, %v1495_v34 }
 0x32d   : > { %898 = vmatprep.mubr.bf16.mxu0 %v1606_v0 }
 0x334   : > { %1384 = vmatmul.mubr.msk.bf16.gmra.mrb[24].mxu0 %vm384_vm1, %v1496_v35 }
 0x335   : > { %908 = vmatprep.mubr.bf16.mxu0 %v1606_v0 }
 0x33c   : > { %1385 = vmatmul.mubr.msk.bf16.gmra.mrb[28].mxu0 %vm384_vm1, %v1497_v36 }
 0x33d   : > { %918 = vmatprep.mubr.bf16.mxu0 %v1606_v0 }
 0x344   : > { %1386 = vmatmul.mubr.msk.bf16.gmra.mrb[32].mxu0 %vm384_vm1, %v1498_v37 }
 0x345   : > { %1239 = vmatprep.mubr.bf16.mxu0 %v1606_v0 }
 0x3ff   : > { %v890_v38 = vpop.f32.mrb[20].mxu0 }
 0x400   : > { %v892_v39 = vpop.f32.mrb[21].mxu0 }
 0x401   : > { %v894_v40 = vpop.f32.mrb[22].mxu0 }
 0x402   : > { %v929_v41 = vpack.c.bf16 %v894_v40, %v890_v38  ;;  %v896_v42 = vpop.f32.mrb[23].mxu0 }
 0x403   : > { %v930_v43 = vpack.c.bf16 %v896_v42, %v892_v39 }
 0x404   : > { %v937_v45 = vmax.bf16 %v1606_v0, %v929_v41 }
 0x405   : > { %v938_v44 = vmax.bf16 %v1606_v0, %v930_v43  ;;  %v1503_v43 = vld [vmem:[%s1983_s7] sm:$0xff]  }
 0x407   : > { %v900_v46 = vpop.f32.mrb[24].mxu0  ;;  %985 = vmatprep.subr.bf16.mxu1 %v938_v44  ;;  %v1504_v44 = vld [vmem:[%s1983_s7 + $0x8] sm:$0xff]  }
 0x408   : > { %v902_v47 = vpop.f32.mrb[25].mxu0  ;;  %986 = vmatpush1.bf16.msra.mxu1 %v937_v45  ;;  %v1505_v45 = vld [vmem:[%s1983_s7 + $0x10] sm:$0xff]  }
 0x409   : > { %v904_v48 = vpop.f32.mrb[26].mxu0 }
 0x40a   : > { %v931_v49 = vpack.c.bf16 %v904_v48, %v900_v46  ;;  %v906_v50 = vpop.f32.mrb[27].mxu0  ;;  %v1506_v46 = vld [vmem:[%s1983_s7 + $0x18] sm:$0xff]  }
 0x40b   : > { %v932_v51 = vpack.c.bf16 %v906_v50, %v902_v47 }
 0x40c   : > { %v939_v53 = vmax.bf16 %v1606_v0, %v931_v49 }
 0x40d   : > { %v940_v52 = vmax.bf16 %v1606_v0, %v932_v51 }
 0x40f   : > { %v910_v54 = vpop.f32.mrb[28].mxu0  ;;  %987 = vmatprep.subr.bf16.mxu1 %v940_v52 }
 0x410   : > { %v912_v55 = vpop.f32.mrb[29].mxu0  ;;  %988 = vmatpush1.bf16.msra.mxu1 %v939_v53 }
 0x411   : > { %v914_v56 = vpop.f32.mrb[30].mxu0 }
 0x412   : > { %v933_v57 = vpack.c.bf16 %v914_v56, %v910_v54  ;;  %v916_v58 = vpop.f32.mrb[31].mxu0 }
 0x413   : > { %v934_v59 = vpack.c.bf16 %v916_v58, %v912_v55 }
 0x414   : > { %v941_v61 = vmax.bf16 %v1606_v0, %v933_v57 }
 0x415   : > { %v942_v60 = vmax.bf16 %v1606_v0, %v934_v59 }
 0x417   : > { %v920_v62 = vpop.f32.mrb[32].mxu0  ;;  %989 = vmatprep.subr.bf16.mxu1 %v942_v60 }
 0x418   : > { %v922_v63 = vpop.f32.mrb[33].mxu0  ;;  %990 = vmatpush1.bf16.msra.mxu1 %v941_v61 }
 0x419   : > { %v924_v1 = vpop.f32.mrb[34].mxu0 }
 0x41a   : > { %v935_v3 = vpack.c.bf16 %v924_v1, %v920_v62  ;;  %v926_v5 = vpop.f32.mrb[35].mxu0 }
 0x41b   : > { %v936_v6 = vpack.c.bf16 %v926_v5, %v922_v63 }
 0x41c   : > { %v943_v8 = vmax.bf16 %v1606_v0, %v935_v3 }
 0x41d   : > { %v944_v7 = vmax.bf16 %v1606_v0, %v936_v6 }
 0x41f   : > { %991 = vmatprep.subr.bf16.mxu1 %v944_v7 }
 0x420   : > { %992 = vmatpush1.bf16.msra.mxu1 %v943_v8 }
 0x423   : > { %1391 = vmatmul.mubr.msk.bf16.vlgmr.msra.gmra.mrb[16].mxu1 %vm521_vm2, %v1499_v9 }
 0x424   : > { %1027 = vmatprep.mubr.bf16.mxu1 %v1606_v0 }
 0x42b   : > { %1392 = vmatmul.mubr.msk.bf16.gmra.mrb[20].mxu1 %vm521_vm2, %v1500_v10 }
 0x42c   : > { %1037 = vmatprep.mubr.bf16.mxu1 %v1606_v0 }
 0x433   : > { %1393 = vmatmul.mubr.msk.bf16.gmra.mrb[24].mxu1 %vm521_vm2, %v1501_v11 }
 0x434   : > { %1047 = vmatprep.mubr.bf16.mxu1 %v1606_v0 }
 0x43b   : > { %1394 = vmatmul.mubr.msk.bf16.gmra.mrb[28].mxu1 %vm521_vm2, %v1502_v12 }
 0x43c   : > { %1146 = vmatprep.mubr.bf16.mxu1 %v1606_v0 }
 0x4f6   : > { %v1019_v13 = vpop.f32.mrb[16].mxu1 }
 0x4f7   : > { %v1021_v14 = vpop.f32.mrb[17].mxu1 }
 0x4f8   : > { %v1023_v15 = vpop.f32.mrb[18].mxu1 }
 0x4f9   : > { %v1058_v16 = vpack.c.bf16 %v1023_v15, %v1019_v13  ;;  %v1025_v17 = vpop.f32.mrb[19].mxu1 }
 0x4fa   : > { %v1059_v18 = vpack.c.bf16 %v1025_v17, %v1021_v14 }
 0x4fb   : > { %v1066_v20 = vmax.bf16 %v1606_v0, %v1058_v16 }
 0x4fc   : > { %v1067_v19 = vmax.bf16 %v1606_v0, %v1059_v18  ;;  %v1203_v18 = vld [vmem:[%s1984_s8] sm:$0x3] }
 0x4fe   : > { %v1029_v21 = vpop.f32.mrb[20].mxu1  ;;  %1114 = vmatprep.subr.bf16.mxu1 %v1067_v19 }
 0x4ff   : > { %v1031_v22 = vpop.f32.mrb[21].mxu1  ;;  %1115 = vmatpush1.bf16.msra.mxu1 %v1066_v20 }
 0x500   : > { %v1033_v23 = vpop.f32.mrb[22].mxu1 }
 0x501   : > { %v1060_v24 = vpack.c.bf16 %v1033_v23, %v1029_v21  ;;  %v1035_v25 = vpop.f32.mrb[23].mxu1 }
 0x502   : > { %v1061_v26 = vpack.c.bf16 %v1035_v25, %v1031_v22 }
 0x503   : > { %v1068_v28 = vmax.bf16 %v1606_v0, %v1060_v24 }
 0x504   : > { %v1069_v27 = vmax.bf16 %v1606_v0, %v1061_v26 }
 0x506   : > { %v1039_v29 = vpop.f32.mrb[24].mxu1  ;;  %1116 = vmatprep.subr.bf16.mxu1 %v1069_v27 }
 0x507   : > { %v1041_v30 = vpop.f32.mrb[25].mxu1  ;;  %1117 = vmatpush1.bf16.msra.mxu1 %v1068_v28 }
 0x508   : > { %v1043_v31 = vpop.f32.mrb[26].mxu1 }
 0x509   : > { %v1062_v32 = vpack.c.bf16 %v1043_v31, %v1039_v29  ;;  %v1045_v33 = vpop.f32.mrb[27].mxu1 }
 0x50a   : > { %v1063_v2 = vpack.c.bf16 %v1045_v33, %v1041_v30 }
 0x50b   : > { %v1070_v34 = vmax.bf16 %v1606_v0, %v1062_v32 }
 0x50c   : > { %v1071_v4 = vmax.bf16 %v1606_v0, %v1063_v2 }
 0x50e   : > { %v1049_v35 = vpop.f32.mrb[28].mxu1  ;;  %1118 = vmatprep.subr.bf16.mxu1 %v1071_v4 }
 0x50f   : > { %v1051_v36 = vpop.f32.mrb[29].mxu1  ;;  %1119 = vmatpush1.bf16.msra.mxu1 %v1070_v34 }
 0x510   : > { %v1053_v37 = vpop.f32.mrb[30].mxu1 }
 0x511   : > { %v1064_v38 = vpack.c.bf16 %v1053_v37, %v1049_v35  ;;  %v1055_v39 = vpop.f32.mrb[31].mxu1 }
 0x512   : > { %v1065_v40 = vpack.c.bf16 %v1055_v39, %v1051_v36 }
 0x513   : > { %v1072_v42 = vmax.bf16 %v1606_v0, %v1064_v38 }
 0x514   : > { %v1073_v41 = vmax.bf16 %v1606_v0, %v1065_v40 }
 0x516   : > { %1120 = vmatprep.subr.bf16.mxu1 %v1073_v41 }
 0x517   : > { %1121 = vmatpush1.bf16.msra.mxu1 %v1072_v42 }
 0x51a   : > { %1399 = vmatmul.mubr.msk.bf16.vlgmr.msra.gmra.mrb[32].mxu1 %vm521_vm2, %v1503_v43 }
 0x51b   : > { %1156 = vmatprep.mubr.bf16.mxu1 %v1606_v0 }
 0x522   : > { %1400 = vmatmul.mubr.msk.bf16.gmra.mrb[36].mxu1 %vm521_vm2, %v1504_v44 }
 0x523   : > { %1166 = vmatprep.mubr.bf16.mxu1 %v1606_v0 }
 0x52a   : > { %1401 = vmatmul.mubr.msk.bf16.gmra.mrb[40].mxu1 %vm521_vm2, %v1505_v45 }
 0x52b   : > { %1176 = vmatprep.mubr.bf16.mxu1 %v1606_v0 }
 0x532   : > { %1402 = vmatmul.mubr.msk.bf16.gmra.mrb[44].mxu1 %vm521_vm2, %v1506_v46 }
 0x5ed   : > { %v1148_v47 = vpop.f32.mrb[32].mxu1 }
 0x5ee   : > { %v1150_v48 = vpop.f32.mrb[33].mxu1 }
 0x5ef   : > { %v1152_v49 = vpop.f32.mrb[34].mxu1 }
 0x5f0   : > { %v1187_v50 = vpack.c.bf16 %v1152_v49, %v1148_v47  ;;  %v1154_v51 = vpop.f32.mrb[35].mxu1 }
 0x5f1   : > { %v1188_v52 = vpack.c.bf16 %v1154_v51, %v1150_v48 }
 0x5f2   : > { %v1195_v54 = vmax.bf16 %v1606_v0, %v1187_v50 }
 0x5f3   : > { %v1196_v53 = vmax.bf16 %v1606_v0, %v1188_v52 }
 0x5f5   : > { %v1158_v55 = vpop.f32.mrb[36].mxu1  ;;  %1207 = vmatprep.subr.bf16.mxu0 %v1196_v53 }
 0x5f6   : > { %v1160_v56 = vpop.f32.mrb[37].mxu1  ;;  %1208 = vmatpush1.bf16.msra.mxu0 %v1195_v54 }
 0x5f7   : > { %v1162_v57 = vpop.f32.mrb[38].mxu1 }
 0x5f8   : > { %v1189_v58 = vpack.c.bf16 %v1162_v57, %v1158_v55  ;;  %v1164_v59 = vpop.f32.mrb[39].mxu1 }
 0x5f9   : > { %v1190_v60 = vpack.c.bf16 %v1164_v59, %v1160_v56 }
 0x5fa   : > { %v1197_v62 = vmax.bf16 %v1606_v0, %v1189_v58 }
 0x5fb   : > { %v1198_v61 = vmax.bf16 %v1606_v0, %v1190_v60 }
 0x5fd   : > { %v1168_v63 = vpop.f32.mrb[40].mxu1  ;;  %1209 = vmatprep.subr.bf16.mxu0 %v1198_v61 }
 0x5fe   : > { %v1170_v1 = vpop.f32.mrb[41].mxu1  ;;  %1210 = vmatpush1.bf16.msra.mxu0 %v1197_v62 }
 0x5ff   : > { %v1172_v3 = vpop.f32.mrb[42].mxu1 }
 0x600   : > { %v1191_v5 = vpack.c.bf16 %v1172_v3, %v1168_v63  ;;  %v1174_v6 = vpop.f32.mrb[43].mxu1 }
 0x601   : > { %v1192_v7 = vpack.c.bf16 %v1174_v6, %v1170_v1 }
 0x602   : > { %v1199_v9 = vmax.bf16 %v1606_v0, %v1191_v5 }
 0x603   : > { %v1200_v8 = vmax.bf16 %v1606_v0, %v1192_v7 }
 0x605   : > { %v1178_v10 = vpop.f32.mrb[44].mxu1  ;;  %1211 = vmatprep.subr.bf16.mxu0 %v1200_v8 }
 0x606   : > { %v1180_v11 = vpop.f32.mrb[45].mxu1  ;;  %1212 = vmatpush1.bf16.msra.mxu0 %v1199_v9 }
 0x607   : > { %v1182_v12 = vpop.f32.mrb[46].mxu1 }
 0x608   : > { %v1193_v13 = vpack.c.bf16 %v1182_v12, %v1178_v10  ;;  %v1184_v14 = vpop.f32.mrb[47].mxu1 }
 0x609   : > { %v1194_v15 = vpack.c.bf16 %v1184_v14, %v1180_v11 }
 0x60a   : > { %v1201_v17 = vmax.bf16 %v1606_v0, %v1193_v13 }
 0x60b   : > { %v1202_v16 = vmax.bf16 %v1606_v0, %v1194_v15 }
 0x60d   : > { %1213 = vmatprep.subr.bf16.mxu0 %v1202_v16 }
 0x60e   : > { %1214 = vmatpush1.bf16.msra.mxu0 %v1201_v17 }
 0x611   : > { %1403 = vmatmul.mubr.msk.bf16.vlgmr.msra.gmra.mrb[36].mxu0 %vm521_vm2, %v1203_v18 }
 0x6e4   : > { %v1241_v19 = vpop.f32.mrb[36].mxu0 }
 0x6e5   : > { %v1243_v20 = vpop.f32.mrb[37].mxu0 }
 0x6e6   : > { %v1250_v21 = vcombine.low %v1241_v19, %v1243_v20  ;;  %v1245_v22 = vpop.f32.mrb[38].mxu0 }
 0x6e7   : > { %v1246_v0 = vpop.f32.mrb[39].mxu0 }
 0x6e8   : > { %1252 = vst [vmem:[%s1822_s24] sm:$0x77] %v1250_v21 }
 0x6e9   : > { %1548 = shalt.err (!%p1545_p7)
}
 0x6ea   : > { %s1549_s25 = scalar_lea.hbm %s1931_s22, 128  ;;  %s1553_s21 = scalar_lea.hbm %s1985_s9, 256 }
 0x6eb   : > { %p1550_p8 = scmp.ne.s32.totalorder %s1931_s22, %s1549_s25  ;;  %p1554_p1 = scmp.lt.u32.totalorder %s1931_s22, %s1985_s9 }
 0x6ec   : > { %p1555_p0 = scmp.lt.u32.totalorder %s1553_s21, %s1549_s25  ;;  %p1557_p6 = scmp.lt.u32.totalorder %s1549_s25, %s1931_s22 }
 0x6ed   : > { %p1551_p11 = pnand %p1550_p8, %p1996_p9 }
 0x6ee   : > { %p1556_p5 = por %p1555_p0, %p1554_p1 }
 0x6ef   : > { %p1552_p13 = pneg %p1551_p11 }
 0x6f0   : > { %p1558_p10 = por %p1557_p6, %p1556_p5 }
 0x6f2   : > { %p1559_p12 = pnand %p1558_p10, %p1552_p13 }
 0x6f4   : > { %1562 = shalt.err (!%p1559_p12)
}
 0x6f5   : > { %1430 = dma.vmem_to_hbm [thread:$0]  (%p1996_p9), %s1933_s14, 128, %s1931_s22, %s1254_s26  }
 0x6f6 PF: > { %p1442_p2 = scmp.ge.s32.totalorder %s1601_s12, 2  ;;  %s1280_s13 = sand.u32 1, %s1589_s30  }
 0x6f7   : > { %p1997_p3 = scmp.ne.s32.totalorder %s1990_s20, 0  ;;  %s1281_s28 = scalar_lea.sflag [#allocation4], %s1280_s13 }
 0x6f9   : > { %p1437_p4 = pnand %p1442_p2, %p1997_p3 }
 0x6fb   : > { %1584 = dma.done.wait (!%p1437_p4), %s1281_s28, 128  }
 0x6fc   : > { %1586 = vsyncadd (!%p1437_p4), %s1281_s28, 4294967168  ;;  %p20_p7 = scmp.ge.s32.totalorder %s1684_s15, 4   ;;  %s1998_s30 = smov %s1593_s10 }
 0x6fd   : > { %s1999_s10 = smov %s1597_s11  ;;  %s2000_s11 = smov %s1695_s18 }
 0x6fe   : > { %s2001_s12 = smov %s1684_s15  ;;  %22 = sbr.rel (!%p20_p7) target bundleno = 4 (0x4), region = 97 }
 0x705   :  { %1286 = vsyncpa [#allocation3], 1 }
 0x706   :  { %1288 = vsyncpa [#allocation3 + $0x1], 1 }
 0x707   :  { %1289 = vsyncpa [#allocation4], 1 }
 0x708   :  { %1291 = vsyncpa [#allocation4 + $0x1], 1 }

</bundles_post_ra>
